<compile_context>
chip_gen: v6e
topology: v6e:2x2x1
jax: 0.10.0
libtpu: 0.0.40
codegen_flags: <defaults>
</compile_context>

<pallas_src>
import jax
import jax.numpy as jnp
from jax.experimental import pallas as pl
from jax.experimental.pallas import tpu as pltpu


def _ensemble_kernel(x_ref, t_ref, w1x_ref, w1t_ref, b1_ref, w2_ref, b2_ref,
                     out_ref):
    # x_ref   : [B, D_in]
    # t_ref   : [B, 1]
    # w1x_ref : [D_in, E*H]   (concatenated first-layer weights, x part)
    # w1t_ref : [1, E*H]      (first-layer weights for the t feature)
    # b1_ref  : [1, E*H]
    # w2_ref  : [E*H, N_pad]  (block-diagonal second-layer weights, lane-padded)
    # b2_ref  : [1, N_pad]
    # out_ref : [B, N_pad]    (per-member logits in column blocks of width C)
    x = x_ref[...]
    t = t_ref[...]                                        # [B, 1]

    # Layer 1: one wide MXU matmul + rank-1 t update on the VPU.
    h = jnp.dot(x, w1x_ref[...], preferred_element_type=jnp.float32)
    h = h + t * w1t_ref[...] + b1_ref[...]
    h = jnp.maximum(h, 0.0)                               # ReLU

    # Layer 2: block-diagonal matmul over all members at once (lane-dense N).
    out = jnp.dot(h, w2_ref[...], preferred_element_type=jnp.float32)
    out_ref[...] = (out + b2_ref[...]).astype(out_ref.dtype)


def mlp_naive_ensemble_forward(x, t, params):
    """Pallas forward of MLPNaiveEnsemble.

    x : [B, D_in] float32
    t : [B]       float32 (per-sample conditioning scalar)
    params: stacked per-member weights
        W1 [E, D_in+1, H], b1 [E, H], W2 [E, H, C], b2 [E, C]

    Returns (logits [E, B, C], None) -- matching the PyTorch module.
    """
    W1, b1, W2, b2 = params["W1"], params["b1"], params["W2"], params["b2"]
    E, D1, H = W1.shape
    _, _, C = W2.shape
    D_in = D1 - 1
    B = x.shape[0]
    EH = E * H
    EC = E * C
    # Pad the output lane dimension up to a multiple of 128 -> unmasked stores.
    N_pad = ((EC + 127) // 128) * 128

    # --- Parameter re-layout (tiny; in practice fold into param preparation) --
    # Concatenate first-layer weights across members along the H axis.
    w1x = jnp.transpose(W1[:, :D_in, :], (1, 0, 2)).reshape(D_in, EH)
    w1t = W1[:, D_in, :].reshape(1, EH)
    b1c = b1.reshape(1, EH)
    # Block-diagonal second-layer weights: member e maps its H block to its
    # own C block of the output; padded with zeros to N_pad lanes.
    eye = jnp.eye(E, dtype=W2.dtype)
    w2bd = jnp.einsum("ehc,ef->ehfc", W2, eye).reshape(EH, EC)
    w2bd = jnp.pad(w2bd, ((0, 0), (0, N_pad - EC)))
    b2c = jnp.pad(b2.reshape(1, EC), ((0, 0), (0, N_pad - EC)))

    x = x.astype(jnp.float32)
    t2 = t.reshape(B, 1).astype(jnp.float32)

    flops = 2 * B * D_in * EH + 2 * B * EH * N_pad + 4 * B * EH
    bytes_accessed = 4 * (x.size + t2.size + w1x.size + w1t.size + b1c.size
                          + w2bd.size + b2c.size + B * N_pad)

    out_pad = pl.pallas_call(
        _ensemble_kernel,
        out_shape=jax.ShapeDtypeStruct((B, N_pad), jnp.float32),
        grid_spec=pltpu.PrefetchScalarGridSpec(
            num_scalar_prefetch=0,
            grid=(1,),  # single invocation: everything resident in VMEM
            in_specs=[
                pl.BlockSpec((B, D_in), lambda i: (0, 0)),    # x
                pl.BlockSpec((B, 1), lambda i: (0, 0)),       # t
                pl.BlockSpec((D_in, EH), lambda i: (0, 0)),   # W1 (x part)
                pl.BlockSpec((1, EH), lambda i: (0, 0)),      # W1 (t row)
                pl.BlockSpec((1, EH), lambda i: (0, 0)),      # b1
                pl.BlockSpec((EH, N_pad), lambda i: (0, 0)),  # W2 block-diag
                pl.BlockSpec((1, N_pad), lambda i: (0, 0)),   # b2
            ],
            out_specs=pl.BlockSpec((B, N_pad), lambda i: (0, 0)),
        ),
        compiler_params=pltpu.CompilerParams(
            dimension_semantics=("arbitrary",),
        ),
        cost_estimate=pl.CostEstimate(
            flops=flops, transcendentals=0, bytes_accessed=bytes_accessed),
    )(x, t2, w1x, w1t, b1c, w2bd, b2c)

    # Un-pad and re-arrange the [B, E*C] slab into [E, B, C] (cheap XLA glue).
    out = out_pad[:, :EC].reshape(B, E, C).transpose(1, 0, 2)
    return out, None


def init_params(key, E, D_in, H, C):
    """Deterministic synthetic parameter init (stacked over ensemble axis)."""
    D1 = D_in + 1
    k1, k2, k3, k4 = jax.random.split(key, 4)
    return {
        "W1": jax.random.normal(k1, (E, D1, H), jnp.float32) * (1.0 / jnp.sqrt(D1)),
        "b1": jax.random.normal(k2, (E, H), jnp.float32) * 0.01,
        "W2": jax.random.normal(k3, (E, H, C), jnp.float32) * (1.0 / jnp.sqrt(H)),
        "b2": jax.random.normal(k4, (E, C), jnp.float32) * 0.01,
    }


def _reference_forward(x, t, params):
    """Pure-JAX reference (mirrors the per-member PyTorch MLP + torch.stack)."""
    xin = jnp.concatenate([x, t[:, None]], axis=-1)

    def one(W1, b1, W2, b2):
        h = jnp.maximum(xin @ W1 + b1, 0.0)
        return h @ W2 + b2

    return jax.vmap(one)(params["W1"], params["b1"], params["W2"], params["b2"])


if __name__ == "__main__":
    # Small shapes consistent with the module's forward: x [B, D_in], t [B].
    E, B, D_in, H, C = 3, 8, 16, 32, 4

    key = jax.random.PRNGKey(0)
    kx, kt, kp = jax.random.split(key, 3)
    x = jax.random.normal(kx, (B, D_in), jnp.float32)
    t = jax.random.uniform(kt, (B,), jnp.float32)
    params = init_params(kp, E, D_in, H, C)

    logits, none_out = mlp_naive_ensemble_forward(x, t, params)
    logits = jax.block_until_ready(logits)

    assert logits.shape == (E, B, C)
    assert none_out is None

    ref = _reference_forward(x, t, params)
    assert jnp.allclose(logits, ref, atol=1e-4, rtol=1e-4), (
        float(jnp.max(jnp.abs(logits - ref))))

    print("KERNEL_OK")
</pallas_src>

<mosaic_0001>
module attributes {stable_mosaic.version = 11 : i64} {
  func.func @_ensemble_kernel(%arg0: i32, %arg1: memref<8x16xf32, #tpu.memory_space<vmem>>, %arg2: memref<8x1xf32, #tpu.memory_space<vmem>>, %arg3: memref<16x96xf32, #tpu.memory_space<vmem>>, %arg4: memref<1x96xf32, #tpu.memory_space<vmem>>, %arg5: memref<1x96xf32, #tpu.memory_space<vmem>>, %arg6: memref<96x128xf32, #tpu.memory_space<vmem>>, %arg7: memref<1x128xf32, #tpu.memory_space<vmem>>, %arg8: memref<8x128xf32, #tpu.memory_space<vmem>>) attributes {dimension_semantics = [#tpu.dimension_semantics<arbitrary>], iteration_bounds = array<i64: 1>, scalar_prefetch = 0 : i64, scratch_operands = 0 : i64, tpu.core_type = #tpu.core_type<tc>, window_params = [{pipeline_mode = #tpu.pipeline_mode<synchronous>, transform_indices = @transform_0, window_bounds = array<i64: 8, 16>}, {pipeline_mode = #tpu.pipeline_mode<synchronous>, transform_indices = @transform_1, window_bounds = array<i64: 8, 1>}, {pipeline_mode = #tpu.pipeline_mode<synchronous>, transform_indices = @transform_2, window_bounds = array<i64: 16, 96>}, {pipeline_mode = #tpu.pipeline_mode<synchronous>, transform_indices = @transform_3, window_bounds = array<i64: 1, 96>}, {pipeline_mode = #tpu.pipeline_mode<synchronous>, transform_indices = @transform_4, window_bounds = array<i64: 1, 96>}, {pipeline_mode = #tpu.pipeline_mode<synchronous>, transform_indices = @transform_5, window_bounds = array<i64: 96, 128>}, {pipeline_mode = #tpu.pipeline_mode<synchronous>, transform_indices = @transform_6, window_bounds = array<i64: 1, 128>}, {pipeline_mode = #tpu.pipeline_mode<synchronous>, transform_indices = @transform_7, window_bounds = array<i64: 8, 128>}]} {
    %c0 = arith.constant 0 : index
    %c0_0 = arith.constant 0 : index
    %0 = vector.load %arg1[%c0, %c0_0] : memref<8x16xf32, #tpu.memory_space<vmem>>, vector<8x16xf32>
    %c0_1 = arith.constant 0 : index
    %c0_2 = arith.constant 0 : index
    %1 = vector.load %arg2[%c0_1, %c0_2] : memref<8x1xf32, #tpu.memory_space<vmem>>, vector<8x1xf32>
    %c0_3 = arith.constant 0 : index
    %c0_4 = arith.constant 0 : index
    %2 = vector.load %arg3[%c0_3, %c0_4] : memref<16x96xf32, #tpu.memory_space<vmem>>, vector<16x96xf32>
    %cst = arith.constant dense<0.000000e+00> : vector<8x96xf32>
    %3 = tpu.matmul %0, %2, %cst {dimension_numbers = #tpu.dot_dimension_numbers<[1], [0], [0], [1], [0, 0, 1, 1], [], []>} : vector<8x16xf32>, vector<16x96xf32>, vector<8x96xf32> -> vector<8x96xf32>
    %c0_5 = arith.constant 0 : index
    %c0_6 = arith.constant 0 : index
    %4 = vector.load %arg4[%c0_5, %c0_6] : memref<1x96xf32, #tpu.memory_space<vmem>>, vector<1x96xf32>
    %5 = vector.broadcast %1 : vector<8x1xf32> to vector<8x96xf32>
    %6 = vector.broadcast %4 : vector<1x96xf32> to vector<8x96xf32>
    %7 = arith.mulf %5, %6 : vector<8x96xf32>
    %8 = arith.addf %3, %7 : vector<8x96xf32>
    %c0_7 = arith.constant 0 : index
    %c0_8 = arith.constant 0 : index
    %9 = vector.load %arg5[%c0_7, %c0_8] : memref<1x96xf32, #tpu.memory_space<vmem>>, vector<1x96xf32>
    %10 = vector.broadcast %9 : vector<1x96xf32> to vector<8x96xf32>
    %11 = arith.addf %8, %10 : vector<8x96xf32>
    %cst_9 = arith.constant 0.000000e+00 : f32
    %12 = vector.broadcast %cst_9 : f32 to vector<8x96xf32>
    %13 = arith.maximumf %11, %12 : vector<8x96xf32>
    %c0_10 = arith.constant 0 : index
    %c0_11 = arith.constant 0 : index
    %14 = vector.load %arg6[%c0_10, %c0_11] : memref<96x128xf32, #tpu.memory_space<vmem>>, vector<96x128xf32>
    %cst_12 = arith.constant dense<0.000000e+00> : vector<8x128xf32>
    %15 = tpu.matmul %13, %14, %cst_12 {dimension_numbers = #tpu.dot_dimension_numbers<[1], [0], [0], [1], [0, 0, 1, 1], [], []>} : vector<8x96xf32>, vector<96x128xf32>, vector<8x128xf32> -> vector<8x128xf32>
    %c0_13 = arith.constant 0 : index
    %c0_14 = arith.constant 0 : index
    %16 = vector.load %arg7[%c0_13, %c0_14] : memref<1x128xf32, #tpu.memory_space<vmem>>, vector<1x128xf32>
    %17 = vector.broadcast %16 : vector<1x128xf32> to vector<8x128xf32>
    %18 = arith.addf %15, %17 : vector<8x128xf32>
    %c0_15 = arith.constant 0 : index
    %c0_16 = arith.constant 0 : index
    %19 = vector.load %arg8[%c0_15, %c0_16] : memref<8x128xf32, #tpu.memory_space<vmem>>, vector<8x128xf32>
    tpu.vector_store %arg8[%c0_15, %c0_16], %18 {strides = array<i32>} : memref<8x128xf32, #tpu.memory_space<vmem>>, vector<8x128xf32>,
    return
  }
  func.func @transform_0(%arg0: i32) -> (i32, i32) {
    %c0_i32 = arith.constant 0 : i32
    %c0_i32_0 = arith.constant 0 : i32
    %c0_i32_1 = arith.constant 0 : i32
    return %c0_i32, %c0_i32_0 : i32, i32
  }
  func.func @transform_1(%arg0: i32) -> (i32, i32) {
    %c0_i32 = arith.constant 0 : i32
    %c0_i32_0 = arith.constant 0 : i32
    %c0_i32_1 = arith.constant 0 : i32
    return %c0_i32, %c0_i32_0 : i32, i32
  }
  func.func @transform_2(%arg0: i32) -> (i32, i32) {
    %c0_i32 = arith.constant 0 : i32
    %c0_i32_0 = arith.constant 0 : i32
    %c0_i32_1 = arith.constant 0 : i32
    return %c0_i32, %c0_i32_0 : i32, i32
  }
  func.func @transform_3(%arg0: i32) -> (i32, i32) {
    %c0_i32 = arith.constant 0 : i32
    %c0_i32_0 = arith.constant 0 : i32
    %c0_i32_1 = arith.constant 0 : i32
    return %c0_i32, %c0_i32_0 : i32, i32
  }
  func.func @transform_4(%arg0: i32) -> (i32, i32) {
    %c0_i32 = arith.constant 0 : i32
    %c0_i32_0 = arith.constant 0 : i32
    %c0_i32_1 = arith.constant 0 : i32
    return %c0_i32, %c0_i32_0 : i32, i32
  }
  func.func @transform_5(%arg0: i32) -> (i32, i32) {
    %c0_i32 = arith.constant 0 : i32
    %c0_i32_0 = arith.constant 0 : i32
    %c0_i32_1 = arith.constant 0 : i32
    return %c0_i32, %c0_i32_0 : i32, i32
  }
  func.func @transform_6(%arg0: i32) -> (i32, i32) {
    %c0_i32 = arith.constant 0 : i32
    %c0_i32_0 = arith.constant 0 : i32
    %c0_i32_1 = arith.constant 0 : i32
    return %c0_i32, %c0_i32_0 : i32, i32
  }
  func.func @transform_7(%arg0: i32) -> (i32, i32) {
    %c0_i32 = arith.constant 0 : i32
    %c0_i32_0 = arith.constant 0 : i32
    %c0_i32_1 = arith.constant 0 : i32
    return %c0_i32, %c0_i32_0 : i32, i32
  }
}

</mosaic_0001>

<bundles_post_ra>
// kernel: tpu_custom_call.1
= control target key start
LH: loop header
LB: loop body
LE: loop exit
PB: predicated region body
PF: predicated region fallthrough
CT: control target
= control target key end

     0   :  { %12 = vsyncpa [#allocation3], 0  ;;  %s467_s0 = inlined_call_operand.vmem [shape: f32[8,16], index: 0, kind: input, shape index: {}]   ;;  %s468_s1 = inlined_call_operand.vmem [shape: f32[8,1], index: 1, kind: input, shape index: {}]   ;;  %s469_s2 = inlined_call_operand.hbm [shape: f32[16,96], index: 2, kind: input, shape index: {}]   ;;  %s470_s3 = inlined_call_operand.vmem [shape: f32[1,96], index: 3, kind: input, shape index: {}]   ;;  %s471_s4 = inlined_call_operand.vmem [shape: f32[1,96], index: 4, kind: input, shape index: {}]   ;;  %s472_s5 = inlined_call_operand.hbm [shape: f32[96,128], index: 5, kind: input, shape index: {}]   ;;  %s473_s6 = inlined_call_operand.vmem [shape: f32[1,128], index: 6, kind: input, shape index: {}]   ;;  %s474_s7 = inlined_call_operand.hbm [shape: f32[8,128], index: 7, kind: output, shape index: {}]  }
   0x1   :  { %13 = vsyncpa [#allocation6], 0 }
   0x2   :  { %14 = vsyncpa [#allocation4], 0  ;;  %s395_s24 = smov [#allocation2]  }
   0x3   :  { %s24_s25 = sshll.u32 %s395_s24, 4  ;;  %s25_s25 = int_to_ptr.vmem [resolvable:$true] %s24_s25 }
   0x4   :  { %s337_s26 = scalar_lea.vmem %s25_s25, 256  ;;  %p342_p1 = scmp.lt.s32.totalorder %s25_s25, %s25_s25 }
   0x5   :  { %p338_p0 = scmp.ne.s32.totalorder %s25_s25, %s337_s26  ;;  %p343_p2 = scmp.lt.s32.totalorder %s337_s26, %s337_s26 }
   0x7   :  { %p344_p3 = por %p343_p2, %p342_p1 }
   0x9   :  { %p345_p4 = pnand %p344_p3, %p338_p0 }
   0xb   :  { %348 = shalt.err (!%p345_p4)
}
   0xc   :  { %s396_s27 = smov 128   ;;  %s397_s28 = smov 8  }
   0xd   :  { %30 = dma.hbm_to_vmem [thread:$0]  %s469_s2, 256, %s25_s25, [#allocation3], %s396_s27, %s396_s27, %s397_s28  }
   0xe   :  { %s398_s8 = smov [#allocation5]  }
   0xf   :  { %s40_s9 = sshll.u32 %s398_s8, 4  ;;  %s41_s9 = int_to_ptr.vmem [resolvable:$true] %s40_s9 }
  0x10   :  { %s357_s10 = scalar_lea.vmem %s41_s9, 1536  ;;  %p362_p6 = scmp.lt.s32.totalorder %s41_s9, %s41_s9 }
  0x11   :  { %p358_p5 = scmp.ne.s32.totalorder %s41_s9, %s357_s10  ;;  %p363_p7 = scmp.lt.s32.totalorder %s357_s10, %s357_s10 }
  0x13   :  { %p364_p8 = por %p363_p7, %p362_p6 }
  0x15   :  { %p365_p9 = pnand %p364_p8, %p358_p5 }
  0x17   :  { %368 = shalt.err (!%p365_p9)
}
  0x18   :  { %46 = dma.hbm_to_vmem [thread:$0]  %s472_s5, 1536, %s41_s9, [#allocation6], %s396_s27, %s396_s27, %s397_s28  }
  0x19   :  { %389 = dma.done.wait [#allocation3], 256  }
  0x1a   :  { %390 = vsyncadd [#allocation3], 4294967040 }
  0x1b   :  { %391 = dma.done.wait [#allocation6], 1536  }
  0x1c   :  { %392 = vsyncadd [#allocation6], 4294965760  ;;  %v399_v0 = vmov 0.0   ;;  %vm400_vm0 = vmmov 0   ;;  %v401_v1 = vmov 0   ;;  %v58_v2 = vld [vmem:[#allocation2 + $0x8] sm:$0xff] }
  0x1d   :  { %286 = vmatprep.subr.mxu0 %v399_v0  ;;  %290 = vmatprep.mubr.msk.f32.mxu0 %vm400_vm0, %v399_v0  ;;  %v57_v3 = vld [vmem:[#allocation2] sm:$0xff]  ;;  %vm72_vm1 = vcmask 130048   ;;  %v166_v6 = vld [vmem:[#allocation5 + $0x58] sm:$0xff]  ;;  %v164_v8 = vld [vmem:[#allocation5 + $0x48] sm:$0xff]  ;;  %vm174_vm2 = vcmask 785408   ;;  %s402_s19 = smov [#allocation7]  }
  0x1e   :  { %328 = vset.pattern.permute.xlu0 %v401_v1  ;;  %293 = vmatprep.subr.mxu1 %v399_v0  ;;  %v55_v4 = vld [vmem:[%s467_s0] sm:$0xff]  ;;  %v163_v9 = vld [vmem:[#allocation5 + $0x40] sm:$0xff]  ;;  %v162_v10 = vld [vmem:[#allocation5 + $0x38] sm:$0xff]  ;;  %s255_s20 = sshll.u32 %s402_s19, 4  ;;  %s256_s20 = int_to_ptr.vmem [resolvable:$true] %s255_s20 }
  0x1f   :  { %317 = vmatprep.mubr.msk.f32.mxu1 %vm400_vm0, %v399_v0  ;;  %287 = vmatpush3.msra.mxu0 %v58_v2  ;;  %v56_v5 = vld [vmem:[%s468_s1] sm:$0xff]  ;;  %v160_v12 = vld [vmem:[#allocation5 + $0x28] sm:$0xff]  ;;  %v159_v13 = vld [vmem:[#allocation5 + $0x20] sm:$0xff]  ;;  %p374_p11 = scmp.lt.s32.totalorder %s256_s20, %s256_s20 }
  0x20   :  { %288 = vmatprep.subr.mxu0 %v399_v0  ;;  %62 = vperm.xlu0 %328, %v56_v5   ;;  %v165_v7 = vld [vmem:[#allocation5 + $0x50] sm:$0xff]  ;;  %v158_v14 = vld [vmem:[#allocation5 + $0x18] sm:$0xff]  ;;  %v156_v16 = vld [vmem:[#allocation5 + $0x8] sm:$0xff] }
  0x21   :  { %289 = vmatpush3.msra.mxu0 %v57_v3  ;;  %294 = vmatpush3.msra.mxu1 %v166_v6  ;;  %v161_v11 = vld [vmem:[#allocation5 + $0x30] sm:$0xff]  ;;  %v155_v17 = vld [vmem:[#allocation5] sm:$0xff] }
  0x22   :  { %291 = vmatmul.mubr.msk.f32.vlgmr.msra.gmra.mxu0 %vm72_vm1, %v55_v4  ;;  %295 = vmatprep.subr.mxu1 %v399_v0  ;;  %v157_v15 = vld [vmem:[#allocation5 + $0x10] sm:$0xff] }
  0x23   :  { %296 = vmatpush3.msra.mxu1 %v165_v7  ;;  %v265_v18 = vld [vmem:[%s470_s3] ss:$0 sm:$0xff]  ;;  %s369_s3 = scalar_lea.vmem %s256_s20, 128 }
  0x24   :  { %297 = vmatprep.subr.mxu1 %v399_v0  ;;  %v267_v22 = vld [vmem:[%s471_s4] ss:$0 sm:$0xff]  ;;  %p370_p10 = scmp.ne.s32.totalorder %s256_s20, %s369_s3  ;;  %p375_p12 = scmp.lt.s32.totalorder %s369_s3, %s369_s3 }
  0x25   :  { %298 = vmatpush3.msra.mxu1 %v164_v8  ;;  %v268_v27 = vld [vmem:[%s473_s6] ss:$0 sm:$0xff] }
  0x26   :  { %299 = vmatprep.subr.mxu1 %v399_v0  ;;  %p376_p13 = por %p375_p12, %p374_p11 }
  0x27   :  { %300 = vmatpush3.msra.mxu1 %v163_v9 }
  0x28   :  { %301 = vmatprep.subr.mxu1 %v399_v0  ;;  %p377_p0 = pnand %p376_p13, %p370_p10 }
  0x29   :  { %302 = vmatpush3.msra.mxu1 %v162_v10 }
  0x2a   :  { %303 = vmatprep.subr.mxu1 %v399_v0 }
  0x2b   :  { %304 = vmatpush3.msra.mxu1 %v161_v11 }
  0x2c   :  { %305 = vmatprep.subr.mxu1 %v399_v0 }
  0x2d   :  { %306 = vmatpush3.msra.mxu1 %v160_v12 }
  0x2e   :  { %307 = vmatprep.subr.mxu1 %v399_v0 }
  0x2f   :  { %308 = vmatpush3.msra.mxu1 %v159_v13 }
  0x30   :  { %309 = vmatprep.subr.mxu1 %v399_v0 }
  0x31   :  { %310 = vmatpush3.msra.mxu1 %v158_v14 }
  0x32   :  { %311 = vmatprep.subr.mxu1 %v399_v0 }
  0x33   :  { %312 = vmatpush3.msra.mxu1 %v157_v15 }
  0x34   :  { %313 = vmatprep.subr.mxu1 %v399_v0 }
  0x35   :  { %314 = vmatpush3.msra.mxu1 %v156_v16 }
  0x36   :  { %315 = vmatprep.subr.mxu1 %v399_v0 }
  0x37   :  { %316 = vmatpush3.msra.mxu1 %v155_v17 }
  0x9b   :  { %v63_v19 = vpop.permute.xlu0 %62 }
  0x9c   :  { %v71_v20 = vmul.f32 %v265_v18, %v63_v19 }
  0xe2   :  { %v142_v21 = vpop.f32.mrf.mxu0 }
  0xe3   :  { %v143_v23 = vadd.f32 %v142_v21, %v71_v20 }
  0xe4   :  { %v292_v24 = vpop.f32.mrf.mxu0 }
  0xe5   :  { %v153_v25 = vadd.f32 %v267_v22, %v143_v23 }
  0xe7   :  { %v154_v26 = vmax.f32 %v153_v25, 0.0 }
  0xe9   :  { %318 = vmatmul.mubr.msk.f32.vlgmr.msra.gmra.mxu1 %vm174_vm2, %v154_v26 }
 0x1a9   :  { %v244_v28 = vpop.f32.mrf.mxu1 }
 0x1aa   :  { %v245_v29 = vadd.f32 %v268_v27, %v244_v28 }
 0x1ab   :  { %v319_v30 = vpop.f32.mrf.mxu1 }
 0x1ac   :  { %248 = vst [vmem:[#allocation7] sm:$0xff] %v245_v29 }
 0x1ad   :  { %380 = shalt.err (!%p377_p0)
}
 0x1ae   :  { %258 = dma.vmem_to_hbm [thread:$0]  %s256_s20, 128, %s474_s7, [#allocation4]  }
 0x1af   :  { %393 = dma.done.wait [#allocation4], 128  }
 0x1b0   :  { %394 = vsyncadd [#allocation4], 4294967168 }
 0x1b1   :  { %262 = vsyncpa [#allocation3], 1 }
 0x1b2   :  { %263 = vsyncpa [#allocation6], 1 }
 0x1b3   :  { %264 = vsyncpa [#allocation4], 1 }

</bundles_post_ra>
